<compile_context>
chip_gen: v6e
topology: v6e:2x2x1
jax: 0.10.0
libtpu: 0.0.40
codegen_flags: <defaults>
</compile_context>

<pallas_src>
import functools

import jax
import jax.numpy as jnp
import numpy as np
from jax.experimental import pallas as pl
from jax.experimental.pallas import tpu as pltpu


def _round_up(x, m):
    return (x + m - 1) // m * m


def _twinq_fused_kernel(sa_ref, p_ref, out_ref, *, sa_rows, h2, tb):
    """Fused twin-Q forward for one batch tile of `tb` rows.

    p_ref is the packed parameter slab (all rows 8-aligned):
        rows [0, sa_rows)              : W1, both heads side-by-side (lanes=2H)
        next h2 rows                   : W2 block-diagonal (2H, 2H)
        next h2 rows                   : W3 block-diagonal padded to 2H lanes
                                         (lane 0 -> q1, lane 1 -> q2)
        next tb rows                   : b1 replicated across tb rows
        next tb rows                   : b2 replicated across tb rows
        next tb rows                   : b3 replicated (lanes 0/1 only)
    """
    o_w1 = 0
    o_w2 = o_w1 + sa_rows
    o_w3 = o_w2 + h2
    o_b1 = o_w3 + h2
    o_b2 = o_b1 + tb
    o_b3 = o_b2 + tb

    w1 = p_ref[o_w1:o_w1 + sa_rows, :]
    w2 = p_ref[o_w2:o_w2 + h2, :]
    w3 = p_ref[o_w3:o_w3 + h2, :]
    b1 = p_ref[o_b1:o_b1 + tb, :]          # (tb, 2H) pre-replicated -> plain VPU add
    b2 = p_ref[o_b2:o_b2 + tb, :]
    b3 = p_ref[o_b3:o_b3 + tb, :]

    sa = sa_ref[...]                        # (tb, sa_rows)

    # Layer 1 (both heads at once): single MXU push, f32 accumulate.
    h = jnp.maximum(
        jnp.dot(sa, w1, preferred_element_type=jnp.float32) + b1, 0.0)
    # Layer 2: block-diagonal keeps the two heads independent.
    h = jnp.maximum(
        jnp.dot(h, w2, preferred_element_type=jnp.float32) + b2, 0.0)
    # Layer 3: lanes 0/1 of q are q1/q2; remaining lanes are exact zeros.
    q = jnp.dot(h, w3, preferred_element_type=jnp.float32) + b3    # (tb, 2H)

    out_ref[...] = jnp.minimum(q[:, 0:1], q[:, 1:2])               # (tb, 1)


def pack_twinq_params(params, state_dim, action_dim, hidden_dim, tile_b):
    """Pack both heads' weights/biases into one f32 slab of shape
    (round8(S) + round8(A) + 2*2H + 3*tile_b, 2H). Done once, off the hot path.

    Correctness of the head fusion relies on the off-diagonal blocks of W2/W3
    and lanes >= 2 of W3/b3 being exactly zero; repack after any param update.
    """
    h = hidden_dim
    h2 = 2 * h
    s_rows = _round_up(state_dim, 8)
    a_rows = _round_up(action_dim, 8)
    tb = _round_up(tile_b, 8)
    q1, q2 = params["q1"], params["q2"]

    # Layer 1: heads side-by-side along lanes; state/action row blocks 8-padded
    # so row k of the padded (state | action) input multiplies row k of w1.
    w1_full = jnp.concatenate([q1["w1"], q2["w1"]], axis=1)        # (S+A, 2H)
    w1 = jnp.zeros((s_rows + a_rows, h2), jnp.float32)
    w1 = w1.at[:state_dim, :].set(w1_full[:state_dim, :])
    w1 = w1.at[s_rows:s_rows + action_dim, :].set(w1_full[state_dim:, :])

    # Layer 2: block diagonal (2H, 2H).
    w2 = jnp.zeros((h2, h2), jnp.float32)
    w2 = w2.at[:h, :h].set(q1["w2"]).at[h:, h:].set(q2["w2"])

    # Layer 3: block diagonal, padded to 2H lanes (lane 0 = q1, lane 1 = q2).
    w3 = jnp.zeros((h2, h2), jnp.float32)
    w3 = w3.at[:h, 0:1].set(q1["w3"]).at[h:, 1:2].set(q2["w3"])

    # Biases pre-replicated across the batch tile -> no in-kernel broadcast.
    b1 = jnp.tile(jnp.concatenate([q1["b1"], q2["b1"]], axis=1), (tb, 1))
    b2 = jnp.tile(jnp.concatenate([q1["b2"], q2["b2"]], axis=1), (tb, 1))
    b3_row = jnp.zeros((1, h2), jnp.float32)
    b3_row = b3_row.at[0, 0].set(q1["b3"][0, 0]).at[0, 1].set(q2["b3"][0, 0])
    b3 = jnp.tile(b3_row, (tb, 1))

    slab = jnp.concatenate([w1, w2, w3, b1, b2, b3], axis=0)
    meta = dict(s_rows=s_rows, a_rows=a_rows, h2=h2, tb=tb)
    return slab, meta


def twinq_forward(state, action, slab, meta):
    """min(q1(sa), q2(sa)) -> shape (B,)."""
    B = state.shape[0]
    s_rows, a_rows, h2, tb = meta["s_rows"], meta["a_rows"], meta["h2"], meta["tb"]
    sa_rows = s_rows + a_rows

    # Merge state/action into one operand (2 operand DMAs total: sa + slab).
    # Feature dims zero-padded to the 8-aligned weight row blocks.
    sa = jnp.zeros((_round_up(B, tb), sa_rows), jnp.float32)
    sa = sa.at[:B, :state.shape[1]].set(state)
    sa = sa.at[:B, s_rows:s_rows + action.shape[1]].set(action)
    b_pad = sa.shape[0]
    n_tiles = b_pad // tb

    kernel = functools.partial(_twinq_fused_kernel,
                               sa_rows=sa_rows, h2=h2, tb=tb)

    slab_bytes = slab.size * slab.dtype.itemsize
    io_bytes = (sa.size + b_pad) * 4 + slab_bytes
    flops = 2 * b_pad * (sa_rows * h2 + h2 * h2 + h2 * h2)

    out = pl.pallas_call(
        kernel,
        out_shape=jax.ShapeDtypeStruct((b_pad, 1), jnp.float32),
        grid=(n_tiles,),
        in_specs=[
            # Batch tile of the merged (state|action) operand.
            pl.BlockSpec((tb, sa_rows), lambda i: (i, 0)),
            # Parameter slab: constant block index -> resident in VMEM,
            # DMA'd exactly once regardless of the number of batch tiles.
            pl.BlockSpec(slab.shape, lambda i: (0, 0)),
        ],
        out_specs=pl.BlockSpec((tb, 1), lambda i: (i, 0)),
        compiler_params=pltpu.CompilerParams(
            dimension_semantics=("parallel",)),   # shards batch tiles on v7x
        cost_estimate=pl.CostEstimate(
            flops=flops, transcendentals=0, bytes_accessed=io_bytes),
    )(sa, slab)
    return out[:B, 0]                                              # squeeze(-1)


def init_mlp_params(key, dims):
    """Deterministic init mimicking nn.Linear's U(-1/sqrt(fan_in), 1/sqrt(fan_in)).
    Weights stored (in, out); biases stored (1, out)."""
    params = {}
    names = ["1", "2", "3"]
    for name, (d_in, d_out) in zip(names, zip(dims[:-1], dims[1:])):
        key, kw, kb = jax.random.split(key, 3)
        bound = 1.0 / np.sqrt(d_in)
        params["w" + name] = jax.random.uniform(
            kw, (d_in, d_out), jnp.float32, -bound, bound)
        params["b" + name] = jax.random.uniform(
            kb, (1, d_out), jnp.float32, -bound, bound)
    return params


def jnp_reference(state, action, params):
    sa = jnp.concatenate([state, action], axis=1)

    def mlp(p):
        h = jnp.maximum(sa @ p["w1"] + p["b1"], 0.0)
        h = jnp.maximum(h @ p["w2"] + p["b2"], 0.0)
        return (h @ p["w3"] + p["b3"])[:, 0]

    return jnp.minimum(mlp(params["q1"]), mlp(params["q2"]))


if __name__ == "__main__":
    batch, state_dim, action_dim, hidden_dim, n_hidden = 8, 16, 8, 32, 2
    dims = [state_dim + action_dim] + [hidden_dim] * n_hidden + [1]

    key = jax.random.PRNGKey(0)
    k_s, k_a, k_q1, k_q2 = jax.random.split(key, 4)
    state = jax.random.normal(k_s, (batch, state_dim), jnp.float32)
    action = jax.random.normal(k_a, (batch, action_dim), jnp.float32)
    params = {"q1": init_mlp_params(k_q1, dims),
              "q2": init_mlp_params(k_q2, dims)}

    # Batch tile = 8 rows here (grid of 1). For large eval batches, pick a
    # bigger tile (e.g. 512) — weights stay resident, per-step overhead
    # amortizes, and VMEM is never a concern at this parameter size.
    slab, meta = pack_twinq_params(params, state_dim, action_dim, hidden_dim,
                                   tile_b=8)

    out = jax.block_until_ready(twinq_forward(state, action, slab, meta))
    ref = jax.block_until_ready(jnp_reference(state, action, params))

    assert out.shape == (batch,), out.shape
    np.testing.assert_allclose(np.asarray(out), np.asarray(ref),
                               rtol=1e-5, atol=1e-5)
    print("KERNEL_OK")
</pallas_src>

<mosaic_0001>
module attributes {stable_mosaic.version = 11 : i64} {
  func.func @_twinq_fused_kernel(%arg0: i32, %arg1: memref<8x24xf32, #tpu.memory_space<vmem>>, %arg2: memref<176x64xf32, #tpu.memory_space<vmem>>, %arg3: memref<8x1xf32, #tpu.memory_space<vmem>>) attributes {dimension_semantics = [#tpu.dimension_semantics<parallel>], iteration_bounds = array<i64: 1>, scalar_prefetch = 0 : i64, scratch_operands = 0 : i64, tpu.core_type = #tpu.core_type<tc>, window_params = [{transform_indices = @transform_0, window_bounds = array<i64: 8, 24>}, {pipeline_mode = #tpu.pipeline_mode<synchronous>, transform_indices = @transform_1, window_bounds = array<i64: 176, 64>}, {transform_indices = @transform_2, window_bounds = array<i64: 8, 1>}]} {
    %c0 = arith.constant 0 : index
    %c0_0 = arith.constant 0 : index
    %0 = vector.load %arg2[%c0, %c0_0] : memref<176x64xf32, #tpu.memory_space<vmem>>, vector<24x64xf32>
    %c24 = arith.constant 24 : index
    %c0_1 = arith.constant 0 : index
    %1 = vector.load %arg2[%c24, %c0_1] : memref<176x64xf32, #tpu.memory_space<vmem>>, vector<64x64xf32>
    %c88 = arith.constant 88 : index
    %c0_2 = arith.constant 0 : index
    %2 = vector.load %arg2[%c88, %c0_2] : memref<176x64xf32, #tpu.memory_space<vmem>>, vector<64x64xf32>
    %c152 = arith.constant 152 : index
    %c0_3 = arith.constant 0 : index
    %3 = vector.load %arg2[%c152, %c0_3] : memref<176x64xf32, #tpu.memory_space<vmem>>, vector<8x64xf32>
    %c160 = arith.constant 160 : index
    %c0_4 = arith.constant 0 : index
    %4 = vector.load %arg2[%c160, %c0_4] : memref<176x64xf32, #tpu.memory_space<vmem>>, vector<8x64xf32>
    %c168 = arith.constant 168 : index
    %c0_5 = arith.constant 0 : index
    %5 = vector.load %arg2[%c168, %c0_5] : memref<176x64xf32, #tpu.memory_space<vmem>>, vector<8x64xf32>
    %c0_6 = arith.constant 0 : index
    %c0_7 = arith.constant 0 : index
    %6 = vector.load %arg1[%c0_6, %c0_7] : memref<8x24xf32, #tpu.memory_space<vmem>>, vector<8x24xf32>
    %cst = arith.constant dense<0.000000e+00> : vector<8x64xf32>
    %7 = tpu.matmul %6, %0, %cst {dimension_numbers = #tpu.dot_dimension_numbers<[1], [0], [0], [1], [0, 0, 1, 1], [], []>} : vector<8x24xf32>, vector<24x64xf32>, vector<8x64xf32> -> vector<8x64xf32>
    %8 = arith.addf %7, %3 : vector<8x64xf32>
    %cst_8 = arith.constant 0.000000e+00 : f32
    %9 = vector.broadcast %cst_8 : f32 to vector<8x64xf32>
    %10 = arith.maximumf %8, %9 : vector<8x64xf32>
    %cst_9 = arith.constant dense<0.000000e+00> : vector<8x64xf32>
    %11 = tpu.matmul %10, %1, %cst_9 {dimension_numbers = #tpu.dot_dimension_numbers<[1], [0], [0], [1], [0, 0, 1, 1], [], []>} : vector<8x64xf32>, vector<64x64xf32>, vector<8x64xf32> -> vector<8x64xf32>
    %12 = arith.addf %11, %4 : vector<8x64xf32>
    %cst_10 = arith.constant 0.000000e+00 : f32
    %13 = vector.broadcast %cst_10 : f32 to vector<8x64xf32>
    %14 = arith.maximumf %12, %13 : vector<8x64xf32>
    %cst_11 = arith.constant dense<0.000000e+00> : vector<8x64xf32>
    %15 = tpu.matmul %14, %2, %cst_11 {dimension_numbers = #tpu.dot_dimension_numbers<[1], [0], [0], [1], [0, 0, 1, 1], [], []>} : vector<8x64xf32>, vector<64x64xf32>, vector<8x64xf32> -> vector<8x64xf32>
    %16 = arith.addf %15, %5 : vector<8x64xf32>
    %17 = vector.extract_strided_slice %16 {offsets = [0, 0], sizes = [8, 1], strides = [1, 1]} : vector<8x64xf32> to vector<8x1xf32>
    %18 = vector.extract_strided_slice %16 {offsets = [0, 1], sizes = [8, 1], strides = [1, 1]} : vector<8x64xf32> to vector<8x1xf32>
    %19 = arith.minimumf %17, %18 : vector<8x1xf32>
    %c0_12 = arith.constant 0 : index
    %c0_13 = arith.constant 0 : index
    %20 = vector.load %arg3[%c0_12, %c0_13] : memref<8x1xf32, #tpu.memory_space<vmem>>, vector<8x1xf32>
    tpu.vector_store %arg3[%c0_12, %c0_13], %19 {strides = array<i32>} : memref<8x1xf32, #tpu.memory_space<vmem>>, vector<8x1xf32>,
    return
  }
  func.func @transform_0(%arg0: i32) -> (i32, i32) {
    %c0_i32 = arith.constant 0 : i32
    %c0_i32_0 = arith.constant 0 : i32
    return %arg0, %c0_i32 : i32, i32
  }
  func.func @transform_1(%arg0: i32) -> (i32, i32) {
    %c0_i32 = arith.constant 0 : i32
    %c0_i32_0 = arith.constant 0 : i32
    %c0_i32_1 = arith.constant 0 : i32
    return %c0_i32, %c0_i32_0 : i32, i32
  }
  func.func @transform_2(%arg0: i32) -> (i32, i32) {
    %c0_i32 = arith.constant 0 : i32
    %c0_i32_0 = arith.constant 0 : i32
    return %arg0, %c0_i32 : i32, i32
  }
}

</mosaic_0001>

<bundles_post_ra>
// kernel: tpu_custom_call.1
= control target key start
LH: loop header
LB: loop body
LE: loop exit
PB: predicated region body
PF: predicated region fallthrough
CT: control target
= control target key end

     0   :  { %v343_v0 = vmov 0.0   ;;  %vm344_vm0 = vmmov 0   ;;  %vm34_vm1 = vcmask 195584   ;;  %vm109_vm2 = vcmask 523264   ;;  %s345_s25 = smov 127   ;;  %s460_s1 = inlined_call_operand.vmem [shape: f32[176,64], index: 1, kind: input, shape index: {}]   ;;  %s461_s0 = inlined_call_operand.vmem [shape: f32[8,24], index: 0, kind: input, shape index: {}]   ;;  %s462_s2 = inlined_call_operand.vmem [shape: f32[8,1], index: 2, kind: output, shape index: {}]  }
   0x1   :  { %293 = vmatprep.subr.mxu0 %v343_v0  ;;  %v13_v1 = vld [vmem:[%s460_s1 + $0x10] sm:$0xff]  ;;  %v12_v2 = vld [vmem:[%s460_s1 + $0x8] sm:$0xff]  ;;  %299 = vmatprep.mubr.msk.f32.mxu0 %vm344_vm0, %v343_v0  ;;  %v11_v5 = vld [vmem:[%s460_s1] sm:$0xff]  ;;  %vm262_vm3 = vcmask 7168  }
   0x2   :  { %294 = vmatpush3.msra.mxu0 %v13_v1  ;;  %302 = vmatprep.subr.mxu1 %v343_v0  ;;  %v21_v3 = vld [vmem:[%s460_s1 + $0x50] sm:$0xff]  ;;  %v20_v4 = vld [vmem:[%s460_s1 + $0x48] sm:$0xff]  ;;  %v33_v6 = vld [vmem:[%s461_s0] sm:$0xff] }
   0x3   :  { %295 = vmatprep.subr.mxu0 %v343_v0  ;;  %303 = vmatpush3.msra.mxu1 %v21_v3  ;;  %v19_v7 = vld [vmem:[%s460_s1 + $0x40] sm:$0xff]  ;;  %v18_v8 = vld [vmem:[%s460_s1 + $0x38] sm:$0xff]  ;;  %v17_v9 = vld [vmem:[%s460_s1 + $0x30] sm:$0xff] }
   0x4   :  { %296 = vmatpush3.msra.mxu0 %v12_v2  ;;  %304 = vmatprep.subr.mxu1 %v343_v0  ;;  %v16_v10 = vld [vmem:[%s460_s1 + $0x28] sm:$0xff]  ;;  %v15_v11 = vld [vmem:[%s460_s1 + $0x20] sm:$0xff]  ;;  %v14_v12 = vld [vmem:[%s460_s1 + $0x18] sm:$0xff] }
   0x5   :  { %297 = vmatprep.subr.mxu0 %v343_v0  ;;  %305 = vmatpush3.msra.mxu1 %v20_v4  ;;  %v29_v13 = vld [vmem:[%s460_s1 + $0x90] sm:$0xff]  ;;  %v28_v14 = vld [vmem:[%s460_s1 + $0x88] sm:$0xff]  ;;  %v27_v15 = vld [vmem:[%s460_s1 + $0x80] sm:$0xff] }
   0x6   :  { %298 = vmatpush3.msra.mxu0 %v11_v5  ;;  %306 = vmatprep.subr.mxu1 %v343_v0  ;;  %v26_v16 = vld [vmem:[%s460_s1 + $0x78] sm:$0xff]  ;;  %v25_v17 = vld [vmem:[%s460_s1 + $0x70] sm:$0xff]  ;;  %v24_v23 = vld [vmem:[%s460_s1 + $0x68] sm:$0xff] }
   0x7   :  { %300 = vmatmul.mubr.msk.f32.vlgmr.msra.gmra.mxu0 %vm34_vm1, %v33_v6  ;;  %307 = vmatpush3.msra.mxu1 %v19_v7  ;;  %v30_v18 = vld [vmem:[%s460_s1 + $0x98] sm:$0xff]  ;;  %v23_v24 = vld [vmem:[%s460_s1 + $0x60] sm:$0xff]  ;;  %v32_v31 = vld [vmem:[%s460_s1 + $0xa8] sm:$0xff] }
   0x8   :  { %308 = vmatprep.subr.mxu1 %v343_v0  ;;  %318 = vmatprep.mubr.msk.f32.mxu1 %vm344_vm0, %v343_v0  ;;  %v22_v25 = vld [vmem:[%s460_s1 + $0x58] sm:$0xff]  ;;  %v31_v26 = vld [vmem:[%s460_s1 + $0xa0] sm:$0xff] }
   0x9   :  { %309 = vmatpush3.msra.mxu1 %v18_v8  ;;  %321 = vmatprep.subr.mxu0 %v343_v0 }
   0xa   :  { %310 = vmatprep.subr.mxu1 %v343_v0  ;;  %337 = vmatprep.mubr.msk.f32.mxu0 %vm344_vm0, %v343_v0 }
   0xb   :  { %311 = vmatpush3.msra.mxu1 %v17_v9  ;;  %322 = vmatpush3.msra.mxu0 %v29_v13 }
   0xc   :  { %312 = vmatprep.subr.mxu1 %v343_v0  ;;  %323 = vmatprep.subr.mxu0 %v343_v0 }
   0xd   :  { %313 = vmatpush3.msra.mxu1 %v16_v10  ;;  %324 = vmatpush3.msra.mxu0 %v28_v14 }
   0xe   :  { %314 = vmatprep.subr.mxu1 %v343_v0  ;;  %325 = vmatprep.subr.mxu0 %v343_v0 }
   0xf   :  { %315 = vmatpush3.msra.mxu1 %v15_v11  ;;  %326 = vmatpush3.msra.mxu0 %v27_v15 }
  0x10   :  { %316 = vmatprep.subr.mxu1 %v343_v0  ;;  %327 = vmatprep.subr.mxu0 %v343_v0 }
  0x11   :  { %317 = vmatpush3.msra.mxu1 %v14_v12  ;;  %328 = vmatpush3.msra.mxu0 %v26_v16 }
  0x12   :  { %329 = vmatprep.subr.mxu0 %v343_v0 }
  0x13   :  { %330 = vmatpush3.msra.mxu0 %v25_v17 }
  0x14   :  { %331 = vmatprep.subr.mxu0 %v343_v0 }
  0x15   :  { %332 = vmatpush3.msra.mxu0 %v24_v23 }
  0x16   :  { %333 = vmatprep.subr.mxu0 %v343_v0 }
  0x17   :  { %334 = vmatpush3.msra.mxu0 %v23_v24 }
  0x18   :  { %335 = vmatprep.subr.mxu0 %v343_v0 }
  0x19   :  { %336 = vmatpush3.msra.mxu0 %v22_v25 }
  0xc7   :  { %v104_v19 = vpop.f32.mrf.mxu0 }
  0xc8   :  { %v105_v20 = vadd.f32 %v104_v19, %v30_v18 }
  0xc9   :  { %v301_v21 = vpop.f32.mrf.mxu0 }
  0xca   :  { %v108_v22 = vmax.f32 %v105_v20, 0.0 }
  0xcc   :  { %319 = vmatmul.mubr.msk.f32.vlgmr.msra.gmra.mxu1 %vm109_vm2, %v108_v22 }
 0x18c   :  { %v179_v27 = vpop.f32.mrf.mxu1 }
 0x18d   :  { %v180_v28 = vadd.f32 %v179_v27, %v31_v26 }
 0x18e   :  { %v320_v29 = vpop.f32.mrf.mxu1 }
 0x18f   :  { %v183_v30 = vmax.f32 %v180_v28, 0.0 }
 0x191   :  { %338 = vmatmul.mubr.msk.f32.vlgmr.msra.gmra.mxu0 %vm109_vm2, %v183_v30 }
 0x251   :  { %v253_v32 = vpop.f32.mrf.mxu0 }
 0x252   :  { %v254_v33 = vadd.f32 %v253_v32, %v32_v31 }
 0x253   :  { %v339_v34 = vpop.f32.mrf.mxu0 }
 0x254   :  { %258 = vrot.lane.b32.xlu0 %v254_v33, %s345_s25 }
 0x2c6   :  { %v259_v35 = vpop.permute.xlu0 %258 }
 0x2c7   :  { %v261_v36 = vmin.f32 %v254_v33, %v259_v35 }
 0x2c9   :  { %263 = vst.msk [vmem:[%s462_s2] sm:$0xff] %vm262_vm3, %v261_v36 }

</bundles_post_ra>
